<compile_context>
chip_gen: v7x
topology: tpu7x:2x2x1
jax: 0.10.0
libtpu: 0.0.40
codegen_flags: <defaults>
</compile_context>

<pallas_src>
import math

import jax
import jax.numpy as jnp
from jax.experimental import pallas as pl
from jax.experimental.pallas import tpu as pltpu

# Module-level constants from the PyTorch source
SIZE_TOKEN_EMBEDDINGS = 64                  # D
HIDDEN = SIZE_TOKEN_EMBEDDINGS * 4          # 256
ROW_TILE = 512                              # logical rows per grid step (multiple of 16)


def _round_up(v, m):
    return ((v + m - 1) // m) * m


def feed_forward_kernel(x_ref, w1_ref, b1_ref, w2_ref, b2_ref, o_ref):
    # Packed layout: each row of x_ref holds TWO consecutive logical rows
    # ([x[2j] | x[2j+1]], 128 lanes).  Weights are block-diag(W, W) so the packed
    # matmul computes both logical rows at once and the output stays packed.
    #   x_ref : (TRp, 2D)  f32      w1_ref: (2D, 2H) bf16    b1_ref: (1, 2H) f32
    #   w2_ref: (2H, 2D)   bf16     b2_ref: (1, 2D)  f32     o_ref : (TRp, 2D) f32
    x = x_ref[...].astype(jnp.bfloat16)          # in-kernel cast (x DMA'd as f32)

    # Layer 1: bf16 MXU matmul, f32 accumulate; bias + ReLU on the VPU in f32.
    h = jnp.dot(x, w1_ref[...], preferred_element_type=jnp.float32)
    h = jnp.maximum(h + b1_ref[...], 0.0)

    # Layer 2: cast activations back to bf16 so the MXU runs at full bf16 rate.
    y = jnp.dot(h.astype(jnp.bfloat16), w2_ref[...],
                preferred_element_type=jnp.float32)

    # Lane-dense (128-wide) unmasked store.
    o_ref[...] = y + b2_ref[...]


def prepare_feed_forward_params(w1, b1, w2, b2):
    """One-time parameter preparation (hoisted out of the per-call path).

    Builds the lane-packed operands used by the kernel:
      W1_p = block_diag(W1, W1) in bf16, b1_p = [b1, b1] in f32 (likewise W2/b2).
    block_diag(W, W) is exactly what makes `[xa | xb] @ W_p == [xa@W | xb@W]`.
    """
    d, hidden = w1.shape
    eye2 = jnp.eye(2, dtype=jnp.float32)
    w1p = jnp.kron(eye2, w1.astype(jnp.float32)).astype(jnp.bfloat16)   # (2D, 2H)
    w2p = jnp.kron(eye2, w2.astype(jnp.float32)).astype(jnp.bfloat16)   # (2H, 2D)
    b1p = jnp.tile(b1.reshape(1, hidden).astype(jnp.float32), (1, 2))   # (1, 2H)
    b2p = jnp.tile(b2.reshape(1, d).astype(jnp.float32), (1, 2))        # (1, 2D)
    return w1p, b1p, w2p, b2p


def feed_forward(x, packed_params, *, row_tile=ROW_TILE):
    """Applies the FeedForward block to the last dim of x (any leading dims)."""
    w1p, b1p, w2p, b2p = packed_params
    orig_shape = x.shape
    d = orig_shape[-1]
    two_d = 2 * d
    two_h = w1p.shape[-1]
    n = math.prod(orig_shape[:-1])

    x2 = x.reshape(n, d).astype(jnp.float32)     # native f32 at the boundary

    # Pad the row count to even so pairs of rows pack into one 128-lane row.
    n_pad = n + (n % 2)
    if n_pad != n:
        x2 = jnp.pad(x2, ((0, n_pad - n), (0, 0)))
    n_packed = n_pad // 2

    # Free reshape: (n_pad, 64) f32 is bit-identical in HBM to (n_pad//2, 128).
    xp = x2.reshape(n_packed, two_d)

    # Fixed packed row tile; single grid step for small n.
    trp = min(row_tile // 2, _round_up(n_packed, 8))
    grid = (pl.cdiv(n_packed, trp),)

    out = pl.pallas_call(
        feed_forward_kernel,
        out_shape=jax.ShapeDtypeStruct((n_packed, two_d), jnp.float32),
        grid=grid,
        in_specs=[
            pl.BlockSpec((trp, two_d), lambda i: (i, 0)),      # x row tile (packed)
            pl.BlockSpec((two_d, two_h), lambda i: (0, 0)),    # W1_p (resident)
            pl.BlockSpec((1, two_h), lambda i: (0, 0)),        # b1_p (resident)
            pl.BlockSpec((two_h, two_d), lambda i: (0, 0)),    # W2_p (resident)
            pl.BlockSpec((1, two_d), lambda i: (0, 0)),        # b2_p (resident)
        ],
        out_specs=pl.BlockSpec((trp, two_d), lambda i: (i, 0)),
        compiler_params=pltpu.CompilerParams(
            dimension_semantics=("parallel",)),
    )(xp, w1p, b1p, w2p, b2p)

    out = out.reshape(n_pad, d)
    if n_pad != n:
        out = out[:n]
    return out.reshape(orig_shape)


def feed_forward_ref(x, w1, b1, w2, b2):
    # Pure-JAX f32 reference matching the PyTorch module.
    h = jnp.maximum(x @ w1 + b1, 0.0)
    return h @ w2 + b2


if __name__ == "__main__":
    B, T, D = 4, 16, SIZE_TOKEN_EMBEDDINGS

    key = jax.random.PRNGKey(0)
    kx, k1, kb1, k2, kb2 = jax.random.split(key, 5)
    init = lambda k, shape: (0.02 * jax.random.normal(k, shape)).astype(jnp.float32)

    w1 = init(k1, (D, HIDDEN))
    b1 = init(kb1, (HIDDEN,))
    w2 = init(k2, (HIDDEN, D))
    b2 = init(kb2, (D,))
    x = jax.random.normal(kx, (B, T, D), jnp.float32)

    # One-time parameter prep (hoisted); per-call path only runs the kernel.
    packed_params = jax.block_until_ready(
        prepare_feed_forward_params(w1, b1, w2, b2))
    ff = jax.jit(feed_forward)

    out = ff(x, packed_params)
    out = jax.block_until_ready(out)

    ref = feed_forward_ref(x, w1, b1, w2, b2)
    assert out.shape == (B, T, D)
    # Tolerance accounts for bf16 MXU operands (f32 accumulation, f32 bias/ReLU).
    assert jnp.allclose(out, ref, atol=2e-2, rtol=2e-2), "mismatch vs JAX reference"

    print("KERNEL_OK")
</pallas_src>

<mosaic_0001>
module attributes {stable_mosaic.version = 11 : i64} {
  func.func @feed_forward_kernel(%arg0: i32, %arg1: memref<32x128xf32, #tpu.memory_space<vmem>>, %arg2: memref<128x512xbf16, #tpu.memory_space<vmem>>, %arg3: memref<1x512xf32, #tpu.memory_space<vmem>>, %arg4: memref<512x128xbf16, #tpu.memory_space<vmem>>, %arg5: memref<1x128xf32, #tpu.memory_space<vmem>>, %arg6: memref<32x128xf32, #tpu.memory_space<vmem>>) attributes {dimension_semantics = [#tpu.dimension_semantics<parallel>], iteration_bounds = array<i64: 1>, scalar_prefetch = 0 : i64, scratch_operands = 0 : i64, tpu.core_type = #tpu.core_type<tc>, window_params = [{transform_indices = @transform_0, window_bounds = array<i64: 32, 128>}, {pipeline_mode = #tpu.pipeline_mode<synchronous>, transform_indices = @transform_1, window_bounds = array<i64: 128, 512>}, {pipeline_mode = #tpu.pipeline_mode<synchronous>, transform_indices = @transform_2, window_bounds = array<i64: 1, 512>}, {pipeline_mode = #tpu.pipeline_mode<synchronous>, transform_indices = @transform_3, window_bounds = array<i64: 512, 128>}, {pipeline_mode = #tpu.pipeline_mode<synchronous>, transform_indices = @transform_4, window_bounds = array<i64: 1, 128>}, {transform_indices = @transform_5, window_bounds = array<i64: 32, 128>}]} {
    %c0 = arith.constant 0 : index
    %c0_0 = arith.constant 0 : index
    %0 = vector.load %arg1[%c0, %c0_0] : memref<32x128xf32, #tpu.memory_space<vmem>>, vector<32x128xf32>
    %1 = arith.truncf %0 : vector<32x128xf32> to vector<32x128xbf16>
    %c0_1 = arith.constant 0 : index
    %c0_2 = arith.constant 0 : index
    %2 = vector.load %arg2[%c0_1, %c0_2] : memref<128x512xbf16, #tpu.memory_space<vmem>>, vector<128x512xbf16>
    %cst = arith.constant dense<0.000000e+00> : vector<32x512xf32>
    %3 = tpu.matmul %1, %2, %cst {dimension_numbers = #tpu.dot_dimension_numbers<[1], [0], [0], [1], [0, 0, 1, 1], [], []>} : vector<32x128xbf16>, vector<128x512xbf16>, vector<32x512xf32> -> vector<32x512xf32>
    %c0_3 = arith.constant 0 : index
    %c0_4 = arith.constant 0 : index
    %4 = vector.load %arg3[%c0_3, %c0_4] : memref<1x512xf32, #tpu.memory_space<vmem>>, vector<1x512xf32>
    %5 = vector.broadcast %4 : vector<1x512xf32> to vector<32x512xf32>
    %6 = arith.addf %3, %5 : vector<32x512xf32>
    %cst_5 = arith.constant 0.000000e+00 : f32
    %7 = vector.broadcast %cst_5 : f32 to vector<32x512xf32>
    %8 = arith.maximumf %6, %7 : vector<32x512xf32>
    %9 = arith.truncf %8 : vector<32x512xf32> to vector<32x512xbf16>
    %c0_6 = arith.constant 0 : index
    %c0_7 = arith.constant 0 : index
    %10 = vector.load %arg4[%c0_6, %c0_7] : memref<512x128xbf16, #tpu.memory_space<vmem>>, vector<512x128xbf16>
    %cst_8 = arith.constant dense<0.000000e+00> : vector<32x128xf32>
    %11 = tpu.matmul %9, %10, %cst_8 {dimension_numbers = #tpu.dot_dimension_numbers<[1], [0], [0], [1], [0, 0, 1, 1], [], []>} : vector<32x512xbf16>, vector<512x128xbf16>, vector<32x128xf32> -> vector<32x128xf32>
    %c0_9 = arith.constant 0 : index
    %c0_10 = arith.constant 0 : index
    %12 = vector.load %arg5[%c0_9, %c0_10] : memref<1x128xf32, #tpu.memory_space<vmem>>, vector<1x128xf32>
    %13 = vector.broadcast %12 : vector<1x128xf32> to vector<32x128xf32>
    %14 = arith.addf %11, %13 : vector<32x128xf32>
    %c0_11 = arith.constant 0 : index
    %c0_12 = arith.constant 0 : index
    %15 = vector.load %arg6[%c0_11, %c0_12] : memref<32x128xf32, #tpu.memory_space<vmem>>, vector<32x128xf32>
    tpu.vector_store %arg6[%c0_11, %c0_12], %14 {strides = array<i32>} : memref<32x128xf32, #tpu.memory_space<vmem>>, vector<32x128xf32>,
    return
  }
  func.func @transform_0(%arg0: i32) -> (i32, i32) {
    %c0_i32 = arith.constant 0 : i32
    %c0_i32_0 = arith.constant 0 : i32
    return %arg0, %c0_i32 : i32, i32
  }
  func.func @transform_1(%arg0: i32) -> (i32, i32) {
    %c0_i32 = arith.constant 0 : i32
    %c0_i32_0 = arith.constant 0 : i32
    %c0_i32_1 = arith.constant 0 : i32
    return %c0_i32, %c0_i32_0 : i32, i32
  }
  func.func @transform_2(%arg0: i32) -> (i32, i32) {
    %c0_i32 = arith.constant 0 : i32
    %c0_i32_0 = arith.constant 0 : i32
    %c0_i32_1 = arith.constant 0 : i32
    return %c0_i32, %c0_i32_0 : i32, i32
  }
  func.func @transform_3(%arg0: i32) -> (i32, i32) {
    %c0_i32 = arith.constant 0 : i32
    %c0_i32_0 = arith.constant 0 : i32
    %c0_i32_1 = arith.constant 0 : i32
    return %c0_i32, %c0_i32_0 : i32, i32
  }
  func.func @transform_4(%arg0: i32) -> (i32, i32) {
    %c0_i32 = arith.constant 0 : i32
    %c0_i32_0 = arith.constant 0 : i32
    %c0_i32_1 = arith.constant 0 : i32
    return %c0_i32, %c0_i32_0 : i32, i32
  }
  func.func @transform_5(%arg0: i32) -> (i32, i32) {
    %c0_i32 = arith.constant 0 : i32
    %c0_i32_0 = arith.constant 0 : i32
    return %arg0, %c0_i32 : i32, i32
  }
}

</mosaic_0001>

<bundles_post_ra>
// kernel: feed_forward.1
= control target key start
LH: loop header
LB: loop body
LE: loop exit
PB: predicated region body
PF: predicated region fallthrough
CT: control target
= control target key end

     0   :  { %10 = vsyncpa [#allocation3], 0  ;;  %s1121_s0 = inlined_call_operand.vmem [shape: f32[32,128], index: 0, kind: input, shape index: {}]   ;;  %s1122_s1 = inlined_call_operand.hbm [shape: bf16[128,512], index: 1, kind: input, shape index: {}]   ;;  %s1123_s2 = inlined_call_operand.vmem [shape: f32[1,512], index: 2, kind: input, shape index: {}]   ;;  %s1124_s3 = inlined_call_operand.hbm [shape: bf16[512,128], index: 3, kind: input, shape index: {}]   ;;  %s1125_s4 = inlined_call_operand.vmem [shape: f32[1,128], index: 4, kind: input, shape index: {}]   ;;  %s1126_s5 = inlined_call_operand.vmem [shape: f32[32,128], index: 5, kind: output, shape index: {}]  }
   0x1   :  { %11 = vsyncpa [#allocation5], 0  ;;  %s1026_s18 = smov [#allocation2]   ;;  %s978_s22 = scalar_lea.hbm %s1122_s1, 4096 }
   0x2   :  { %s19_s19 = sshll.u32 %s1026_s18, 4  ;;  %p979_p0 = scmp.ne.s32.totalorder %s1122_s1, %s978_s22  ;;  %s20_s19 = int_to_ptr.vmem [resolvable:$true] %s19_s19 }
   0x3   :  { %p982_p1 = scmp.lt.u32.totalorder %s978_s22, %s1122_s1 }
   0x5   :  { %p984_p2 = pnand %p982_p1, %p979_p0 }
   0x7   :  { %987 = shalt.err (!%p984_p2)
}
   0x8   :  { %s988_s27 = scalar_lea.vmem %s20_s19, 4096  ;;  %p993_p4 = scmp.lt.s32.totalorder %s20_s19, %s20_s19 }
   0x9   :  { %p989_p3 = scmp.ne.s32.totalorder %s20_s19, %s988_s27  ;;  %p994_p5 = scmp.lt.s32.totalorder %s988_s27, %s988_s27 }
   0xb   :  { %p995_p6 = por %p994_p5, %p993_p4 }
   0xd   :  { %p996_p7 = pnand %p995_p6, %p989_p3 }
   0xf   :  { %999 = shalt.err (!%p996_p7)
}
  0x10   :  { %s1027_s28 = smov 256   ;;  %s1028_s29 = smov 16  }
  0x11   :  { %25 = dma.hbm_to_vmem [thread:$0]  %s1122_s1, 4096, %s20_s19, [#allocation3], %s1027_s28, %s1027_s28, %s1028_s29  }
  0x12   :  { %s1029_s7 = smov [#allocation4]   ;;  %s1000_s11 = scalar_lea.hbm %s1124_s3, 4096 }
  0x13   :  { %s33_s8 = sshll.u32 %s1029_s7, 4  ;;  %p1001_p8 = scmp.ne.s32.totalorder %s1124_s3, %s1000_s11  ;;  %s34_s8 = int_to_ptr.vmem [resolvable:$true] %s33_s8 }
  0x14   :  { %p1004_p9 = scmp.lt.u32.totalorder %s1000_s11, %s1124_s3 }
  0x16   :  { %p1006_p10 = pnand %p1004_p9, %p1001_p8 }
  0x18   :  { %1009 = shalt.err (!%p1006_p10)
}
  0x19   :  { %s1010_s16 = scalar_lea.vmem %s34_s8, 4096  ;;  %p1015_p12 = scmp.lt.s32.totalorder %s34_s8, %s34_s8 }
  0x1a   :  { %p1011_p11 = scmp.ne.s32.totalorder %s34_s8, %s1010_s16  ;;  %p1016_p13 = scmp.lt.s32.totalorder %s1010_s16, %s1010_s16 }
  0x1c   :  { %p1017_p0 = por %p1016_p13, %p1015_p12 }
  0x1e   :  { %p1018_p1 = pnand %p1017_p0, %p1011_p11 }
  0x20   :  { %1021 = shalt.err (!%p1018_p1)
}
  0x21   :  { %s1030_s1 = smov 64   ;;  %s1031_s17 = smov 4  }
  0x22   :  { %39 = dma.hbm_to_vmem [thread:$0]  %s1124_s3, 4096, %s34_s8, [#allocation5], %s1030_s1, %s1030_s1, %s1031_s17  }
  0x23   :  { %1022 = dma.done.wait [#allocation3], 4096  }
  0x24   :  { %1023 = vsyncadd [#allocation3], 4294963200 }
  0x25   :  { %1024 = dma.done.wait [#allocation5], 4096  }
  0x26   :  { %1025 = vsyncadd [#allocation5], 4294963200  ;;  %v1032_v0 = vmov 0   ;;  %v898_v1 = vld [vmem:[#allocation2 + $0x4] ss:$16 sps:$4 sm:$0xff]   ;;  %v50_v34 = vld [vmem:[%s1121_s0 + $0x8] sm:$0xff] }
  0x27   :  { %301 = vmatprep.mubr.bf16.mxu0 %v1032_v0  ;;  %354 = vmatprep.mubr.bf16.mxu1 %v1032_v0  ;;  %v900_v2 = vld [vmem:[#allocation2 + $0xc] ss:$16 sps:$4 sm:$0xff]   ;;  %v902_v3 = vld [vmem:[#allocation2] ss:$16 sps:$4 sm:$0xff]   ;;  %v903_v4 = vld [vmem:[#allocation2 + $0x8] ss:$16 sps:$4 sm:$0xff]  }
  0x28   :  { %269 = vmatprep.subr.bf16.mxu0 %v898_v1  ;;  %322 = vmatprep.subr.bf16.mxu1 %v900_v2  ;;  %v904_v5 = vld [vmem:[#allocation2 + $0x24] ss:$16 sps:$4 sm:$0xff]   ;;  %v906_v6 = vld [vmem:[#allocation2 + $0x2c] ss:$16 sps:$4 sm:$0xff]   ;;  %v908_v7 = vld [vmem:[#allocation2 + $0x20] ss:$16 sps:$4 sm:$0xff]  }
  0x29   :  { %270 = vmatpush1.bf16.msra.mxu0 %v902_v3  ;;  %323 = vmatpush1.bf16.msra.mxu1 %v903_v4  ;;  %v909_v8 = vld [vmem:[#allocation2 + $0x28] ss:$16 sps:$4 sm:$0xff]   ;;  %v910_v9 = vld [vmem:[#allocation2 + $0x44] ss:$16 sps:$4 sm:$0xff]   ;;  %v912_v10 = vld [vmem:[#allocation2 + $0x4c] ss:$16 sps:$4 sm:$0xff]  }
  0x2a   :  { %271 = vmatprep.subr.bf16.mxu0 %v904_v5  ;;  %324 = vmatprep.subr.bf16.mxu1 %v906_v6  ;;  %v914_v11 = vld [vmem:[#allocation2 + $0x40] ss:$16 sps:$4 sm:$0xff]   ;;  %v915_v12 = vld [vmem:[#allocation2 + $0x48] ss:$16 sps:$4 sm:$0xff]   ;;  %v916_v13 = vld [vmem:[#allocation2 + $0x64] ss:$16 sps:$4 sm:$0xff]  }
  0x2b   :  { %v918_v14 = vld [vmem:[#allocation2 + $0x6c] ss:$16 sps:$4 sm:$0xff]   ;;  %v920_v15 = vld [vmem:[#allocation2 + $0x60] ss:$16 sps:$4 sm:$0xff]   ;;  %v921_v16 = vld [vmem:[#allocation2 + $0x68] ss:$16 sps:$4 sm:$0xff]  }
  0x2c   :  { %v922_v17 = vld [vmem:[#allocation2 + $0x84] ss:$16 sps:$4 sm:$0xff]   ;;  %v924_v18 = vld [vmem:[#allocation2 + $0x8c] ss:$16 sps:$4 sm:$0xff]   ;;  %v926_v19 = vld [vmem:[#allocation2 + $0x80] ss:$16 sps:$4 sm:$0xff]  }
  0x2d   :  { %272 = vmatpush1.bf16.msra.mxu0 %v908_v7  ;;  %325 = vmatpush1.bf16.msra.mxu1 %v909_v8  ;;  %v927_v20 = vld [vmem:[#allocation2 + $0x88] ss:$16 sps:$4 sm:$0xff]   ;;  %v928_v21 = vld [vmem:[#allocation2 + $0xa4] ss:$16 sps:$4 sm:$0xff]   ;;  %v930_v22 = vld [vmem:[#allocation2 + $0xac] ss:$16 sps:$4 sm:$0xff]   ;;  %v89_v7 = vlaneseq }
  0x2e   :  { %273 = vmatprep.subr.bf16.mxu0 %v910_v9  ;;  %326 = vmatprep.subr.bf16.mxu1 %v912_v10  ;;  %v932_v23 = vld [vmem:[#allocation2 + $0xa0] ss:$16 sps:$4 sm:$0xff]   ;;  %v933_v24 = vld [vmem:[#allocation2 + $0xa8] ss:$16 sps:$4 sm:$0xff]   ;;  %v934_v25 = vld [vmem:[#allocation2 + $0xc4] ss:$16 sps:$4 sm:$0xff]  }
  0x2f   :  { %v936_v26 = vld [vmem:[#allocation2 + $0xcc] ss:$16 sps:$4 sm:$0xff]   ;;  %v938_v27 = vld [vmem:[#allocation2 + $0xc0] ss:$16 sps:$4 sm:$0xff]   ;;  %v939_v28 = vld [vmem:[#allocation2 + $0xc8] ss:$16 sps:$4 sm:$0xff]  }
  0x30   :  { %v940_v29 = vld [vmem:[#allocation2 + $0xe4] ss:$16 sps:$4 sm:$0xff]   ;;  %v942_v30 = vld [vmem:[#allocation2 + $0xec] ss:$16 sps:$4 sm:$0xff]   ;;  %v944_v31 = vld [vmem:[#allocation2 + $0xe0] ss:$16 sps:$4 sm:$0xff]  }
  0x31   :  { %274 = vmatpush1.bf16.msra.mxu0 %v914_v11  ;;  %327 = vmatpush1.bf16.msra.mxu1 %v915_v12  ;;  %v945_v32 = vld [vmem:[#allocation2 + $0xe8] ss:$16 sps:$4 sm:$0xff]   ;;  %v49_v33 = vld [vmem:[%s1121_s0] sm:$0xff]  ;;  %v51_v41 = vld [vmem:[%s1121_s0 + $0x10] sm:$0xff]  ;;  %v90_v8 = vshrl.u32 %v89_v7, 7 }
  0x32   :  { %275 = vmatprep.subr.bf16.mxu0 %v916_v13  ;;  %328 = vmatprep.subr.bf16.mxu1 %v918_v14  ;;  %v946_v35 = vld [vmem:[#allocation4 + $0x40] sm:$0xff]   ;;  %v53_v37 = vpack.c.bf16 %v50_v34, %v49_v33  ;;  %v950_v40 = vld [vmem:[#allocation4 + $0x48] sm:$0xff]   ;;  %v52_v42 = vld [vmem:[%s1121_s0 + $0x18] sm:$0xff] }
  0x33   :  { %v947_v36 = vld [vmem:[#allocation4 + $0xc0] sm:$0xff]   ;;  %v951_v43 = vld [vmem:[#allocation4 + $0xc8] sm:$0xff]   ;;  %v954_v46 = vld [vmem:[#allocation4 + $0x50] sm:$0xff]   ;;  %v54_v48 = vpack.c.bf16 %v52_v42, %v51_v41  ;;  %v91_v9 = vsub.s32 0, %v90_v8  ;;  %v99_v10 = vsub.s32 2, %v90_v8  ;;  %v95_v12 = vsub.s32 1, %v90_v8 }
  0x34   :  { %v948_v38 = vld [vmem:[#allocation4] sm:$0xff]   ;;  %v952_v44 = vld [vmem:[#allocation4 + $0x8] sm:$0xff]   ;;  %v955_v47 = vld [vmem:[#allocation4 + $0xd0] sm:$0xff]   ;;  %v103_v13 = vsub.s32 3, %v90_v8 }
  0x35   :  { %276 = vmatpush1.bf16.msra.mxu0 %v920_v15  ;;  %329 = vmatpush1.bf16.msra.mxu1 %v921_v16  ;;  %v949_v39 = vld [vmem:[#allocation4 + $0x80] sm:$0xff]   ;;  %v953_v45 = vld [vmem:[#allocation4 + $0x88] sm:$0xff]   ;;  %v956_v49 = vld [vmem:[#allocation4 + $0x10] sm:$0xff]  }
  0x36   :  { %277 = vmatprep.subr.bf16.mxu0 %v922_v17  ;;  %330 = vmatprep.subr.bf16.mxu1 %v924_v18  ;;  %v957_v50 = vld [vmem:[#allocation4 + $0x90] sm:$0xff]   ;;  %v958_v51 = vld [vmem:[#allocation4 + $0x58] sm:$0xff]   ;;  %v962_v55 = vld [vmem:[#allocation4 + $0x60] sm:$0xff]  }
  0x37   :  { %v959_v52 = vld [vmem:[#allocation4 + $0xd8] sm:$0xff]   ;;  %v963_v56 = vld [vmem:[#allocation4 + $0xe0] sm:$0xff]   ;;  %v966_v59 = vld [vmem:[#allocation4 + $0x68] sm:$0xff]  }
  0x38   :  { %v960_v53 = vld [vmem:[#allocation4 + $0x18] sm:$0xff]   ;;  %v964_v57 = vld [vmem:[#allocation4 + $0x20] sm:$0xff]   ;;  %v967_v60 = vld [vmem:[#allocation4 + $0xe8] sm:$0xff]  }
  0x39   :  { %278 = vmatpush1.bf16.msra.mxu0 %v926_v19  ;;  %331 = vmatpush1.bf16.msra.mxu1 %v927_v20  ;;  %v961_v54 = vld [vmem:[#allocation4 + $0x98] sm:$0xff]   ;;  %v965_v58 = vld [vmem:[#allocation4 + $0xa0] sm:$0xff]   ;;  %v968_v61 = vld [vmem:[#allocation4 + $0x28] sm:$0xff]  }
  0x3a   :  { %279 = vmatprep.subr.bf16.mxu0 %v928_v21  ;;  %332 = vmatprep.subr.bf16.mxu1 %v930_v22  ;;  %v969_v62 = vld [vmem:[#allocation4 + $0xa8] sm:$0xff]   ;;  %v970_v63 = vld [vmem:[#allocation4 + $0x70] sm:$0xff]   ;;  %v974_v3 = vld [vmem:[#allocation4 + $0x78] sm:$0xff]  }
  0x3b   :  { %v972_v1 = vld [vmem:[#allocation4 + $0x30] sm:$0xff]   ;;  %v975_v4 = vld [vmem:[#allocation4 + $0xf8] sm:$0xff]   ;;  %v87_v11 = vld [vmem:[%s1123_s2] sm:$0xf] }
  0x3c   :  { %v973_v2 = vld [vmem:[#allocation4 + $0xb0] sm:$0xff]   ;;  %v976_v5 = vld [vmem:[#allocation4 + $0x38] sm:$0xff]   ;;  %v92_v14 = vrot.slane %v87_v11, %v91_v9  ;;  %v100_v15 = vrot.slane %v87_v11, %v99_v10  ;;  %v96_v16 = vrot.slane %v87_v11, %v95_v12  ;;  %v104_v17 = vrot.slane %v87_v11, %v103_v13  ;;  %v802_v12 = vld [vmem:[%s1125_s4] ss:$0 sm:$0xff] }
  0x3d   :  { %280 = vmatpush1.bf16.msra.mxu0 %v932_v23  ;;  %333 = vmatpush1.bf16.msra.mxu1 %v933_v24  ;;  %v977_v6 = vld [vmem:[#allocation4 + $0xb8] sm:$0xff]  }
  0x3e   :  { %281 = vmatprep.subr.bf16.mxu0 %v934_v25  ;;  %334 = vmatprep.subr.bf16.mxu1 %v936_v26 }
  0x41   :  { %282 = vmatpush1.bf16.msra.mxu0 %v938_v27  ;;  %335 = vmatpush1.bf16.msra.mxu1 %v939_v28 }
  0x42   :  { %283 = vmatprep.subr.bf16.mxu0 %v940_v29  ;;  %336 = vmatprep.subr.bf16.mxu1 %v942_v30 }
  0x45   :  { %284 = vmatpush1.bf16.msra.mxu0 %v944_v31  ;;  %337 = vmatpush1.bf16.msra.mxu1 %v945_v32 }
  0x46   :  { %835 = vmatprep.subr.bf16.mxu0 %v946_v35  ;;  %863 = vmatprep.subr.bf16.mxu1 %v947_v36 }
  0x48   :  { %302 = vmatmul.mubr.bf16.vlgmr.msra.gmra.mrb[0].mxu0 %v53_v37  ;;  %355 = vmatmul.mubr.bf16.vlgmr.msra.gmra.mrb[0].mxu1 %v53_v37 }
  0x49   :  { %311 = vmatprep.mubr.bf16.mxu0 %v1032_v0  ;;  %364 = vmatprep.mubr.bf16.mxu1 %v1032_v0  ;;  %v971_v0 = vld [vmem:[#allocation4 + $0xf0] sm:$0xff]  }
  0x4a   :  { %836 = vmatpush3.bf16.msra.mxu0 %v948_v38  ;;  %864 = vmatpush3.bf16.msra.mxu1 %v949_v39 }
  0x4b   :  { %837 = vmatprep.subr.bf16.mxu0 %v950_v40  ;;  %865 = vmatprep.subr.bf16.mxu1 %v951_v43 }
  0x4e   :  { %838 = vmatpush3.bf16.msra.mxu0 %v952_v44  ;;  %866 = vmatpush3.bf16.msra.mxu1 %v953_v45 }
  0x4f   :  { %839 = vmatprep.subr.bf16.mxu0 %v954_v46  ;;  %867 = vmatprep.subr.bf16.mxu1 %v955_v47 }
  0x50   :  { %312 = vmatmul.mubr.bf16.gmra.mrb[4].mxu0 %v54_v48  ;;  %365 = vmatmul.mubr.bf16.gmra.mrb[4].mxu1 %v54_v48 }
  0x52   :  { %840 = vmatpush3.bf16.msra.mxu0 %v956_v49  ;;  %868 = vmatpush3.bf16.msra.mxu1 %v957_v50 }
  0x53   :  { %841 = vmatprep.subr.bf16.mxu0 %v958_v51  ;;  %869 = vmatprep.subr.bf16.mxu1 %v959_v52 }
  0x56   :  { %842 = vmatpush3.bf16.msra.mxu0 %v960_v53  ;;  %870 = vmatpush3.bf16.msra.mxu1 %v961_v54 }
  0x57   :  { %843 = vmatprep.subr.bf16.mxu0 %v962_v55  ;;  %871 = vmatprep.subr.bf16.mxu1 %v963_v56 }
  0x5a   :  { %844 = vmatpush3.bf16.msra.mxu0 %v964_v57  ;;  %872 = vmatpush3.bf16.msra.mxu1 %v965_v58 }
  0x5b   :  { %845 = vmatprep.subr.bf16.mxu0 %v966_v59  ;;  %873 = vmatprep.subr.bf16.mxu1 %v967_v60 }
  0x5e   :  { %846 = vmatpush3.bf16.msra.mxu0 %v968_v61  ;;  %874 = vmatpush3.bf16.msra.mxu1 %v969_v62 }
  0x5f   :  { %847 = vmatprep.subr.bf16.mxu0 %v970_v63  ;;  %875 = vmatprep.subr.bf16.mxu1 %v971_v0 }
  0x62   :  { %848 = vmatpush3.bf16.msra.mxu0 %v972_v1  ;;  %876 = vmatpush3.bf16.msra.mxu1 %v973_v2 }
  0x63   :  { %849 = vmatprep.subr.bf16.mxu0 %v974_v3  ;;  %877 = vmatprep.subr.bf16.mxu1 %v975_v4 }
  0x66   :  { %850 = vmatpush3.bf16.msra.mxu0 %v976_v5  ;;  %878 = vmatpush3.bf16.msra.mxu1 %v977_v6 }
 0x11b   :  { %v303_v18 = vpop.f32.mrb[0].mxu0  ;;  %v356_v19 = vpop.f32.mrb[0].mxu1 }
 0x11c   :  { %v304_v20 = vadd.f32 %v303_v18, %v92_v14  ;;  %v357_v21 = vadd.f32 %v356_v19, %v100_v15  ;;  %v305_v22 = vpop.f32.mrb[1].mxu0  ;;  %v358_v23 = vpop.f32.mrb[1].mxu1 }
 0x11d   :  { %v306_v24 = vadd.f32 %v305_v22, %v96_v16  ;;  %v359_v25 = vadd.f32 %v358_v23, %v104_v17  ;;  %v307_v26 = vpop.f32.mrb[2].mxu0  ;;  %v360_v27 = vpop.f32.mrb[2].mxu1 }
 0x11e   :  { %v377_v28 = vmax.f32 %v357_v21, 0.0  ;;  %v308_v29 = vadd.f32 %v307_v26, %v92_v14  ;;  %v361_v30 = vadd.f32 %v360_v27, %v100_v15  ;;  %v309_v31 = vpop.f32.mrb[3].mxu0  ;;  %v362_v32 = vpop.f32.mrb[3].mxu1  ;;  %v375_v36 = vmax.f32 %v304_v20, 0.0 }
 0x11f   :  { %v378_v33 = vmax.f32 %v359_v25, 0.0  ;;  %v310_v34 = vadd.f32 %v309_v31, %v96_v16  ;;  %v363_v35 = vadd.f32 %v362_v32, %v104_v17  ;;  %v376_v39 = vmax.f32 %v306_v24, 0.0 }
 0x120   :  { %v379_v37 = vmax.f32 %v308_v29, 0.0  ;;  %v381_v38 = vmax.f32 %v361_v30, 0.0 }
 0x121   :  { %v380_v40 = vmax.f32 %v310_v34, 0.0  ;;  %v382_v41 = vmax.f32 %v363_v35, 0.0 }
 0x122   :  { %v391_v42 = vpack.c.bf16 %v379_v37, %v375_v36  ;;  %v393_v43 = vpack.c.bf16 %v381_v38, %v377_v28 }
 0x123   :  { %v392_v44 = vpack.c.bf16 %v380_v40, %v376_v39  ;;  %v394_v45 = vpack.c.bf16 %v382_v41, %v378_v33  ;;  %v313_v46 = vpop.f32.mrb[4].mxu0  ;;  %v366_v47 = vpop.f32.mrb[4].mxu1 }
 0x124   :  { %v314_v48 = vadd.f32 %v313_v46, %v92_v14  ;;  %v367_v49 = vadd.f32 %v366_v47, %v100_v15  ;;  %v315_v50 = vpop.f32.mrb[5].mxu0  ;;  %v368_v51 = vpop.f32.mrb[5].mxu1 }
 0x125   :  { %v316_v52 = vadd.f32 %v315_v50, %v96_v16  ;;  %v369_v53 = vadd.f32 %v368_v51, %v104_v17  ;;  %v317_v54 = vpop.f32.mrb[6].mxu0  ;;  %v370_v55 = vpop.f32.mrb[6].mxu1  ;;  %694 = vmatprep.mubr.bf16.mxu0 %v392_v44  ;;  %743 = vmatprep.mubr.bf16.mxu1 %v394_v45 }
 0x126   :  { %v385_v56 = vmax.f32 %v367_v49, 0.0  ;;  %v318_v57 = vadd.f32 %v317_v54, %v92_v14  ;;  %v371_v58 = vadd.f32 %v370_v55, %v100_v15  ;;  %v319_v59 = vpop.f32.mrb[7].mxu0  ;;  %v372_v60 = vpop.f32.mrb[7].mxu1  ;;  %695 = vmatmul.mubr.bf16.vlgmr.msra.gmra.mrb[8].mxu0 %v391_v42  ;;  %744 = vmatmul.mubr.bf16.vlgmr.msra.gmra.mrb[8].mxu1 %v393_v43  ;;  %v383_v0 = vmax.f32 %v314_v48, 0.0 }
 0x127   :  { %v386_v61 = vmax.f32 %v369_v53, 0.0  ;;  %v320_v62 = vadd.f32 %v319_v59, %v96_v16  ;;  %v373_v63 = vadd.f32 %v372_v60, %v104_v17  ;;  %v384_v3 = vmax.f32 %v316_v52, 0.0 }
 0x128   :  { %v387_v1 = vmax.f32 %v318_v57, 0.0  ;;  %v389_v2 = vmax.f32 %v371_v58, 0.0 }
 0x129   :  { %v388_v4 = vmax.f32 %v320_v62, 0.0  ;;  %v390_v5 = vmax.f32 %v373_v63, 0.0 }
 0x12a   :  { %v395_v6 = vpack.c.bf16 %v387_v1, %v383_v0  ;;  %v397_v7 = vpack.c.bf16 %v389_v2, %v385_v56 }
 0x12b   :  { %v396_v8 = vpack.c.bf16 %v388_v4, %v384_v3  ;;  %v398_v9 = vpack.c.bf16 %v390_v5, %v386_v61 }
 0x12d   :  { %702 = vmatprep.mubr.bf16.mxu0 %v396_v8  ;;  %751 = vmatprep.mubr.bf16.mxu1 %v398_v9 }
 0x12e   :  { %703 = vmatmul.mubr.bf16.gmra.mrb[12].mxu0 %v395_v6  ;;  %752 = vmatmul.mubr.bf16.gmra.mrb[12].mxu1 %v397_v7 }
 0x1f9   :  { %v851_v10 = vpop.f32.mrb[8].mxu0  ;;  %v879_v11 = vpop.f32.mrb[8].mxu1 }
 0x1fa   :  { %v852_v13 = vpop.f32.mrb[9].mxu0  ;;  %v880_v14 = vpop.f32.mrb[9].mxu1 }
 0x1fb   :  { %v853_v15 = vadd.f32 %v852_v13, %v851_v10  ;;  %v881_v16 = vadd.f32 %v880_v14, %v879_v11  ;;  %v854_v17 = vpop.f32.mrb[10].mxu0  ;;  %v882_v18 = vpop.f32.mrb[10].mxu1 }
 0x1fc   :  { %v855_v19 = vpop.f32.mrb[11].mxu0  ;;  %v883_v20 = vpop.f32.mrb[11].mxu1 }
 0x1fd   :  { %v697_v21 = vadd.f32 %v853_v15, %v802_v12  ;;  %v856_v22 = vadd.f32 %v855_v19, %v854_v17  ;;  %v884_v23 = vadd.f32 %v883_v20, %v882_v18 }
 0x1ff   :  { %v746_v24 = vadd.f32 %v881_v16, %v697_v21  ;;  %v700_v25 = vadd.f32 %v856_v22, %v802_v12 }
 0x201   :  { %760 = vst [vmem:[%s1126_s5] sm:$0xff] %v746_v24  ;;  %v749_v26 = vadd.f32 %v884_v23, %v700_v25  ;;  %v857_v27 = vpop.f32.mrb[12].mxu0  ;;  %v885_v28 = vpop.f32.mrb[12].mxu1 }
 0x202   :  { %v858_v29 = vpop.f32.mrb[13].mxu0  ;;  %v886_v30 = vpop.f32.mrb[13].mxu1 }
 0x203   :  { %761 = vst [vmem:[%s1126_s5 + $0x8] sm:$0xff] %v749_v26  ;;  %v859_v31 = vadd.f32 %v858_v29, %v857_v27  ;;  %v887_v32 = vadd.f32 %v886_v30, %v885_v28  ;;  %v860_v33 = vpop.f32.mrb[14].mxu0  ;;  %v888_v34 = vpop.f32.mrb[14].mxu1 }
 0x204   :  { %v861_v35 = vpop.f32.mrb[15].mxu0  ;;  %v889_v36 = vpop.f32.mrb[15].mxu1 }
 0x205   :  { %v705_v37 = vadd.f32 %v859_v31, %v802_v12  ;;  %v862_v38 = vadd.f32 %v861_v35, %v860_v33  ;;  %v890_v39 = vadd.f32 %v889_v36, %v888_v34 }
 0x207   :  { %v754_v40 = vadd.f32 %v887_v32, %v705_v37  ;;  %v708_v41 = vadd.f32 %v862_v38, %v802_v12 }
 0x209   :  { %762 = vst [vmem:[%s1126_s5 + $0x10] sm:$0xff] %v754_v40  ;;  %v757_v42 = vadd.f32 %v890_v39, %v708_v41 }
 0x20b   :  { %763 = vst [vmem:[%s1126_s5 + $0x18] sm:$0xff] %v757_v42 }
 0x20c   :  { %768 = vsyncpa [#allocation3], 1 }
 0x20d   :  { %769 = vsyncpa [#allocation5], 1 }

</bundles_post_ra>
